<compile_context>
chip_gen: v5e
topology: v5e:2x2
jax: 0.10.0
libtpu: 0.0.40
codegen_flags: <defaults>
</compile_context>

<pallas_src>
import jax
import jax.numpy as jnp
from jax.experimental import pallas as pl
from jax.experimental.pallas import tpu as pltpu


def _identity_kernel(x_ref, o_ref):
    # The entire forward pass of AttnUnetV6_2 (nn.Identity).
    o_ref[...] = x_ref[...]


_LANES = 128


@jax.jit
def attn_unet_v6_2_forward(x):
    """Pallas implementation of AttnUnetV6_2.forward: returns {'x_recon': x}."""
    orig_shape = x.shape
    total = 1
    for d in orig_shape:
        total *= d

    # Lane-dense 2-D slab: last dim a multiple of 128 when possible.
    if total % _LANES == 0:
        x2d = x.reshape(total // _LANES, _LANES)
    else:
        # Fallback for odd sizes; still a single full-extent block.
        x2d = x.reshape(total, 1)

    out2d = pl.pallas_call(
        _identity_kernel,
        out_shape=jax.ShapeDtypeStruct(x2d.shape, x2d.dtype),
        in_specs=[pl.BlockSpec(memory_space=pltpu.MemorySpace.VMEM)],
        out_specs=pl.BlockSpec(memory_space=pltpu.MemorySpace.VMEM),
        input_output_aliases={0: 0},
    )(x2d)

    return {'x_recon': out2d.reshape(orig_shape)}


if __name__ == "__main__":
    key = jax.random.PRNGKey(0)
    # Small NCHW shapes consistent with the module's conv-style interface.
    x = jax.random.normal(key, (2, 4, 16, 16), dtype=jnp.float32)

    out = attn_unet_v6_2_forward(x)
    jax.block_until_ready(out['x_recon'])

    # Verify exact identity semantics.
    assert out['x_recon'].shape == x.shape
    assert out['x_recon'].dtype == x.dtype
    assert bool(jnp.all(out['x_recon'] == x))

    print("KERNEL_OK")
</pallas_src>

<mosaic_0001>
module attributes {stable_mosaic.version = 11 : i64} {
  func.func @_identity_kernel(%arg0: memref<16x128xf32, #tpu.memory_space<vmem>>, %arg1: memref<16x128xf32, #tpu.memory_space<vmem>>) attributes {dimension_semantics = [], scalar_prefetch = 0 : i64, scratch_operands = 0 : i64, tpu.core_type = #tpu.core_type<tc>} {
    %c0 = arith.constant 0 : index
    %c0_0 = arith.constant 0 : index
    %0 = vector.load %arg0[%c0, %c0_0] : memref<16x128xf32, #tpu.memory_space<vmem>>, vector<16x128xf32>
    %c0_1 = arith.constant 0 : index
    %c0_2 = arith.constant 0 : index
    %1 = vector.load %arg1[%c0_1, %c0_2] : memref<16x128xf32, #tpu.memory_space<vmem>>, vector<16x128xf32>
    tpu.vector_store %arg1[%c0_1, %c0_2], %0 {strides = array<i32>} : memref<16x128xf32, #tpu.memory_space<vmem>>, vector<16x128xf32>,
    return
  }
}

</mosaic_0001>

<bundles_post_ra>
// kernel: attn_unet_v6_2_forward.1
= control target key start
LH: loop header
LB: loop body
LE: loop exit
PB: predicated region body
PF: predicated region fallthrough
CT: control target
= control target key end

     0   :  { %s38_s0 = inlined_call_operand.vmem [shape: f32[16,128], index: 0, kind: input, shape index: {}, may-alias: {0,1}]   ;;  %s39_s1 = inlined_call_operand.vmem [shape: f32[16,128], index: 1, kind: output, shape index: {}, may-alias: {0,1}]  }
   0x1   :  { %v8_v0 = vld [vmem:[%s38_s0] sm:$0xff]  ;;  %v9_v1 = vld [vmem:[%s38_s0 + $0x8] sm:$0xff] }
   0x2   :  { %10 = vst [vmem:[%s39_s1] sm:$0xff] %v8_v0 }
   0x3   :  { %11 = vst [vmem:[%s39_s1 + $0x8] sm:$0xff] %v9_v1 }

</bundles_post_ra>
